<compile_context>
chip_gen: v7x
topology: tpu7x:2x2x1
jax: 0.10.0
libtpu: 0.0.40
codegen_flags: <defaults>
</compile_context>

<pallas_src>
import functools

import jax
import jax.numpy as jnp
from jax.experimental import pallas as pl
from jax.experimental.pallas import tpu as pltpu


_VMEM_LIMIT_BYTES = 32 * 1024 * 1024       # explicit scoped-VMEM limit
_BLOCK_VMEM_BUDGET = 12 * 1024 * 1024      # per-step working-set budget
_MAX_BLOCK_ROWS = 1024                     # cap R = SB * Mp


def _round_up(v, m):
    return (v + m - 1) // m * m


def _ge2e_block_kernel(x_ref, centw_ref, out_ref, *,
                       N, M, SB, Mp, Np, G1, w, accumulate):
    """One grid step = SB speakers x Mp (padded) utterances.

    x_ref:     (SB, Mp, Dp)  input dtype (MXU operand, no upcast)
    centw_ref: (Dp, Np)      w * centroid / ||centroid||, pre-transposed
    out_ref:   (1, 8, 128)   lane-dense per-core loss accumulator
    """
    g0 = pl.program_id(0)
    g1 = pl.program_id(1)
    first_spk = (g0 * G1 + g1) * SB            # global speaker of block row 0

    x3 = x_ref[...]                                              # (SB,Mp,Dp)
    Dp = x3.shape[-1]
    R = SB * Mp
    xf = x3.astype(jnp.float32)
    zero = jnp.float32(0.0)

    # Exclusive centroid per (speaker, utterance) via segment sum over M.
    # Zero-padded utterance rows do not perturb the per-speaker sum.
    spk_sum = jnp.sum(xf, axis=1, keepdims=True)                 # (SB,1,Dp)
    excl = (spk_sum - xf) * jnp.float32(1.0 / (M - 1))           # (SB,Mp,Dp)

    # Row validity: padded utterances of real speakers + padded speakers.
    utt_id = jax.lax.broadcasted_iota(jnp.int32, (SB, Mp, 1), 1)
    spk_id = first_spk + jax.lax.broadcasted_iota(jnp.int32, (SB, Mp, 1), 0)
    row_valid = (utt_id < M) & (spk_id < N)                      # (SB,Mp,1)

    # Inverse norms on the EUP; padded rows guarded against rsqrt(0)=inf.
    # (Like the PyTorch reference, a genuinely zero real embedding still NaNs.)
    ss_x = jnp.sum(xf * xf, axis=-1, keepdims=True)
    ss_e = jnp.sum(excl * excl, axis=-1, keepdims=True)
    inv_xn = jnp.where(row_valid, jax.lax.rsqrt(ss_x), zero)     # (SB,Mp,1)
    inv_en = jnp.where(row_valid, jax.lax.rsqrt(ss_e), zero)     # (SB,Mp,1)

    # MXU: (R, Dp) x (Dp, Np) in the input dtype, f32 accumulation.
    # w is already folded into the table -> this is w * <x, c_k/||c_k||>.
    dots = jax.lax.dot_general(
        x3.reshape(R, Dp), centw_ref[...],
        (((1,), (0,)), ((), ())),
        preferred_element_type=jnp.float32).reshape(SB, Mp, Np)  # (SB,Mp,Np)

    # Row's own exclusive-centroid similarity, scaled by w.
    dots_excl = (jnp.sum(xf * excl, axis=-1, keepdims=True)
                 * inv_en * jnp.float32(w))                      # (SB,Mp,1)

    # Speaker-granular masks: own-speaker column + valid (non-padded) columns.
    col = jax.lax.broadcasted_iota(jnp.int32, (SB, 1, Np), 2)
    blk_spk = first_spk + jax.lax.broadcasted_iota(jnp.int32, (SB, 1, Np), 0)
    own = col == blk_spk                                         # (SB,1,Np)
    col_valid = col < N                                          # (SB,1,Np)

    # cos clamp folded through w (>0): w*max(cos,1e-6) = max(w*cos, w*1e-6).
    # The +b of the reference cancels exactly in (logsumexp - target).
    clamp = jnp.float32(w * 1e-6)
    s = jnp.maximum(jnp.where(own, dots_excl, dots) * inv_xn, clamp)
    s = jnp.where(col_valid, s, jnp.float32(-1e30))              # mask pad cols

    m = jnp.max(s, axis=-1, keepdims=True)
    lse = m + jnp.log(jnp.sum(jnp.exp(s - m), axis=-1, keepdims=True))
    s_tgt = jnp.maximum(dots_excl * inv_xn, clamp)               # (SB,Mp,1)

    block_loss = jnp.sum(jnp.where(row_valid, lse - s_tgt, zero))

    if accumulate:
        @pl.when(g1 == 0)
        def _():
            out_ref[...] = jnp.zeros_like(out_ref)
        out_ref[...] += block_loss
    else:
        # Single reduction step for this core: plain store, no init/RMW.
        out_ref[...] = jnp.zeros_like(out_ref) + block_loss


def _pick_block_speakers(N, Mp, Dp, Np, in_bytes,
                         budget_bytes=_BLOCK_VMEM_BUDGET):
    """Largest speaker-block whose per-step working set fits the budget.

    Honest footprint: x double buffer, double-buffered resident centroid
    table, the two f32 (R, Dp) temporaries (cast + exclusive centroids) and
    ~6 live (R, Np) f32 score/LSE temporaries.
    """
    def footprint(sb):
        r = sb * Mp
        return (2 * r * Dp * in_bytes          # x HBM->VMEM double buffer
                + 2 * Dp * Np * in_bytes       # centroid table (2 buffers)
                + 2 * r * Dp * 4               # xf + excl (f32)
                + 6 * r * Np * 4)              # score / LSE temporaries (f32)

    cap = max(1, min(N, _MAX_BLOCK_ROWS // Mp))
    for sb in range(cap, 0, -1):
        if footprint(sb) <= budget_bytes:
            return sb
    return 1


def ge2e_loss(dvecs, w=10.0, b=-5.0, block_speakers=None):
    """Forward GE2E softmax loss for dvecs of shape (N, M, D). Returns a scalar.

    Forward-only: `b` cancels identically in logsumexp(s) - s[target] and `w`
    is folded into the pre-normalized centroid table.
    # TODO(synk): trainable w/b (the PyTorch module's nn.Parameters) need a
    # custom_vjp / SMEM-scalar path; only the forward value is reproduced.
    """
    N, M, D = dvecs.shape
    assert M >= 2, "GE2E needs at least 2 utterances per speaker"
    w = float(w)
    assert w > 0.0, "w must be positive (PyTorch default init_w=10.0)"
    del b  # cancels exactly in the softmax loss

    in_dtype = dvecs.dtype
    in_bytes = jnp.dtype(in_dtype).itemsize
    Dp = _round_up(max(D, 128), 128)     # lane-dense embedding dim
    Mp = _round_up(M, 8)                 # sublane-aligned utterance dim
    Np = _round_up(max(N, 128), 128)     # lane-dense speaker/column dim

    # Pass 1 (tiny, pure JAX): w-scaled, normalized centroid table laid out
    # (Dp, Np) so the kernel's MXU RHS needs no in-loop transpose.
    xf = dvecs.astype(jnp.float32)
    cent = jnp.mean(xf, axis=1)                                        # (N, D)
    cent_n = cent * jax.lax.rsqrt(jnp.sum(cent * cent, axis=-1, keepdims=True))
    cent_w = jnp.pad(w * cent_n, ((0, Np - N), (0, Dp - D)))           # (Np,Dp)
    cent_w_t = cent_w.T.astype(in_dtype)                               # (Dp,Np)

    # Block / grid selection (speaker-aligned row blocks; SB need not divide N).
    if block_speakers is None:
        SB = _pick_block_speakers(N, Mp, Dp, Np, in_bytes)
    else:
        SB = max(1, min(int(block_speakers), N))
    blocks = -(-N // SB)
    N_pad = SB * blocks

    # Leading "parallel" axis splits blocks across v7x's two TensorCores
    # (separate accumulator rows); neutral on single-TC chips.
    if blocks % 2 == 0:
        G0, G1 = 2, blocks // 2
    else:
        G0, G1 = 1, blocks
    accumulate = G1 > 1

    # Zero padding is inert for sums/dots/norms; padded rows and padded
    # speaker columns are masked inside the kernel.
    x_pad = jnp.pad(dvecs, ((0, N_pad - N), (0, Mp - M), (0, Dp - D)))

    kernel = functools.partial(
        _ge2e_block_kernel, N=N, M=M, SB=SB, Mp=Mp, Np=Np, G1=G1, w=w,
        accumulate=accumulate)

    out = pl.pallas_call(
        kernel,
        out_shape=jax.ShapeDtypeStruct((G0, 8, 128), jnp.float32),
        grid=(G0, G1),
        in_specs=[
            pl.BlockSpec((SB, Mp, Dp), lambda g0, g1: (g0 * G1 + g1, 0, 0)),
            pl.BlockSpec((Dp, Np), lambda g0, g1: (0, 0)),   # resident table
        ],
        out_specs=pl.BlockSpec((1, 8, 128), lambda g0, g1: (g0, 0, 0)),
        compiler_params=pltpu.CompilerParams(
            dimension_semantics=("parallel", "arbitrary"),
            vmem_limit_bytes=_VMEM_LIMIT_BYTES),
    )(x_pad, cent_w_t)
    return jnp.sum(out[:, 0, 0])


def _ge2e_loss_ref(dvecs, w=10.0, b=-5.0):
    """Pure-JAX reference mirroring the PyTorch loops (softmax method)."""
    N, M, D = dvecs.shape
    dvecs = dvecs.astype(jnp.float32)
    centroids = jnp.mean(dvecs, axis=1)  # (N, D)
    total = 0.0
    for j in range(N):
        for i in range(M):
            utt = dvecs[j, i]
            excl = (jnp.sum(dvecs[j], axis=0) - utt) / (M - 1)
            new_c = centroids.at[j].set(excl)  # (N, D)
            cos = jnp.dot(new_c, utt) / (jnp.linalg.norm(utt)
                                         * jnp.linalg.norm(new_c, axis=1))
            cos = jnp.maximum(cos, 1e-6)
            s = cos * w + b
            total = total + (jax.nn.logsumexp(s) - s[j])
    return total


if __name__ == "__main__":
    key = jax.random.PRNGKey(0)
    k1, k2, k3 = jax.random.split(key, 3)

    # Config 1: odd N (speaker padding), M % 8 != 0 (utterance padding),
    # forced SB=2 -> 3 sequential blocks: exercises the accumulator path.
    N1, M1, D1 = 5, 6, 32
    d1 = jax.random.normal(k1, (N1, M1, D1), dtype=jnp.float32)
    l1 = jax.block_until_ready(ge2e_loss(d1, w=10.0, b=-5.0, block_speakers=2))
    r1 = jax.block_until_ready(_ge2e_loss_ref(d1, w=10.0, b=-5.0))
    assert jnp.allclose(l1, r1, rtol=1e-4, atol=1e-3), (l1, r1)

    # Config 2: even block count -> (2, 1) grid with a parallel leading axis
    # and one accumulator row per core (dual-TensorCore split on v7x).
    N2, M2, D2 = 4, 6, 32
    d2 = jax.random.normal(k2, (N2, M2, D2), dtype=jnp.float32)
    l2 = jax.block_until_ready(ge2e_loss(d2, w=10.0, b=-5.0, block_speakers=2))
    r2 = jax.block_until_ready(_ge2e_loss_ref(d2, w=10.0, b=-5.0))
    assert jnp.allclose(l2, r2, rtol=1e-4, atol=1e-3), (l2, r2)

    # Config 3: lane-dense D, automatic block size -> single-step fast path.
    N3, M3, D3 = 3, 5, 128
    d3 = jax.random.normal(k3, (N3, M3, D3), dtype=jnp.float32)
    l3 = jax.block_until_ready(ge2e_loss(d3, w=10.0, b=-5.0))
    r3 = jax.block_until_ready(_ge2e_loss_ref(d3, w=10.0, b=-5.0))
    assert jnp.allclose(l3, r3, rtol=1e-4, atol=1e-3), (l3, r3)

    print("KERNEL_OK")
</pallas_src>

<mosaic_0001>
module attributes {stable_mosaic.version = 11 : i64} {
  func.func @_ge2e_block_kernel(%arg0: i32, %arg1: i32, %arg2: memref<2x8x128xf32, #tpu.memory_space<vmem>>, %arg3: memref<128x128xf32, #tpu.memory_space<vmem>>, %arg4: memref<1x8x128xf32, #tpu.memory_space<vmem>>) attributes {dimension_semantics = [#tpu.dimension_semantics<parallel>, #tpu.dimension_semantics<arbitrary>], iteration_bounds = array<i64: 1, 3>, scalar_prefetch = 0 : i64, scratch_operands = 0 : i64, tpu.core_type = #tpu.core_type<tc>, window_params = [{transform_indices = @transform_0, window_bounds = array<i64: 2, 8, 128>}, {pipeline_mode = #tpu.pipeline_mode<synchronous>, transform_indices = @transform_1, window_bounds = array<i64: 128, 128>}, {transform_indices = @transform_2, window_bounds = array<i64: 1, 8, 128>}]} {
    %c3_i32 = arith.constant 3 : i32
    %0 = arith.muli %arg0, %c3_i32 : i32
    %1 = arith.addi %0, %arg1 : i32
    %c2_i32 = arith.constant 2 : i32
    %2 = arith.muli %1, %c2_i32 : i32
    %c0 = arith.constant 0 : index
    %c0_0 = arith.constant 0 : index
    %c0_1 = arith.constant 0 : index
    %3 = vector.load %arg2[%c0, %c0_0, %c0_1] : memref<2x8x128xf32, #tpu.memory_space<vmem>>, vector<2x8x128xf32>
    %cst = arith.constant dense<0.000000e+00> : vector<2x128xf32>
    %4 = vector.multi_reduction <add>, %3, %cst [1] : vector<2x8x128xf32> to vector<2x128xf32>
    %5 = vector.shape_cast %4 : vector<2x128xf32> to vector<2x1x128xf32>
    %6 = vector.broadcast %5 : vector<2x1x128xf32> to vector<2x8x128xf32>
    %7 = arith.subf %6, %3 : vector<2x8x128xf32>
    %cst_2 = arith.constant 2.000000e-01 : f32
    %8 = vector.broadcast %cst_2 : f32 to vector<2x8x128xf32>
    %9 = arith.mulf %7, %8 : vector<2x8x128xf32>
    %10 = tpu.iota {dimensions = array<i32: 1>} : vector<2x8x1xi32>
    %11 = tpu.iota {dimensions = array<i32: 0>} : vector<2x8x1xi32>
    %12 = vector.broadcast %2 : i32 to vector<2x8x1xi32>
    %13 = arith.addi %12, %11 : vector<2x8x1xi32>
    %c6_i32 = arith.constant 6 : i32
    %14 = vector.broadcast %c6_i32 : i32 to vector<2x8x1xi32>
    %15 = arith.cmpi slt, %10, %14 : vector<2x8x1xi32>
    %c5_i32 = arith.constant 5 : i32
    %16 = vector.broadcast %c5_i32 : i32 to vector<2x8x1xi32>
    %17 = arith.cmpi slt, %13, %16 : vector<2x8x1xi32>
    %18 = arith.andi %15, %17 : vector<2x8x1xi1>
    %19 = arith.mulf %3, %3 : vector<2x8x128xf32>
    %cst_3 = arith.constant dense<0.000000e+00> : vector<2x8xf32>
    %20 = vector.multi_reduction <add>, %19, %cst_3 [2] : vector<2x8x128xf32> to vector<2x8xf32>
    %21 = vector.shape_cast %20 : vector<2x8xf32> to vector<2x8x1xf32>
    %22 = arith.mulf %9, %9 : vector<2x8x128xf32>
    %cst_4 = arith.constant dense<0.000000e+00> : vector<2x8xf32>
    %23 = vector.multi_reduction <add>, %22, %cst_4 [2] : vector<2x8x128xf32> to vector<2x8xf32>
    %24 = vector.shape_cast %23 : vector<2x8xf32> to vector<2x8x1xf32>
    %25 = math.rsqrt %21 : vector<2x8x1xf32>
    %cst_5 = arith.constant 0.000000e+00 : f32
    %26 = vector.broadcast %cst_5 : f32 to vector<2x8x1xf32>
    %27 = arith.select %18, %25, %26 : vector<2x8x1xi1>, vector<2x8x1xf32>
    %28 = math.rsqrt %24 : vector<2x8x1xf32>
    %cst_6 = arith.constant 0.000000e+00 : f32
    %29 = vector.broadcast %cst_6 : f32 to vector<2x8x1xf32>
    %30 = arith.select %18, %28, %29 : vector<2x8x1xi1>, vector<2x8x1xf32>
    %31 = vector.shape_cast %3 : vector<2x8x128xf32> to vector<16x128xf32>
    %c0_7 = arith.constant 0 : index
    %c0_8 = arith.constant 0 : index
    %32 = vector.load %arg3[%c0_7, %c0_8] : memref<128x128xf32, #tpu.memory_space<vmem>>, vector<128x128xf32>
    %cst_9 = arith.constant dense<0.000000e+00> : vector<16x128xf32>
    %33 = tpu.matmul %31, %32, %cst_9 {dimension_numbers = #tpu.dot_dimension_numbers<[1], [0], [0], [1], [0, 0, 1, 1], [], []>} : vector<16x128xf32>, vector<128x128xf32>, vector<16x128xf32> -> vector<16x128xf32>
    %34 = vector.shape_cast %33 : vector<16x128xf32> to vector<2x8x128xf32>
    %35 = arith.mulf %3, %9 : vector<2x8x128xf32>
    %cst_10 = arith.constant dense<0.000000e+00> : vector<2x8xf32>
    %36 = vector.multi_reduction <add>, %35, %cst_10 [2] : vector<2x8x128xf32> to vector<2x8xf32>
    %37 = vector.shape_cast %36 : vector<2x8xf32> to vector<2x8x1xf32>
    %38 = arith.mulf %37, %30 : vector<2x8x1xf32>
    %cst_11 = arith.constant 1.000000e+01 : f32
    %39 = vector.broadcast %cst_11 : f32 to vector<2x8x1xf32>
    %40 = arith.mulf %38, %39 : vector<2x8x1xf32>
    %41 = tpu.iota {dimensions = array<i32: 2>} : vector<2x1x128xi32>
    %42 = tpu.iota {dimensions = array<i32: 0>} : vector<2x1x128xi32>
    %43 = vector.broadcast %2 : i32 to vector<2x1x128xi32>
    %44 = arith.addi %43, %42 : vector<2x1x128xi32>
    %45 = arith.cmpi eq, %41, %44 : vector<2x1x128xi32>
    %c5_i32_12 = arith.constant 5 : i32
    %46 = vector.broadcast %c5_i32_12 : i32 to vector<2x1x128xi32>
    %47 = arith.cmpi slt, %41, %46 : vector<2x1x128xi32>
    %48 = vector.shape_cast %45 : vector<2x1x128xi1> to vector<2x1x128xi1>
    %49 = vector.broadcast %48 : vector<2x1x128xi1> to vector<2x8x128xi1>
    %50 = vector.shape_cast %40 : vector<2x8x1xf32> to vector<2x8x1xf32>
    %51 = vector.broadcast %50 : vector<2x8x1xf32> to vector<2x8x128xf32>
    %52 = arith.select %49, %51, %34 : vector<2x8x128xi1>, vector<2x8x128xf32>
    %53 = vector.broadcast %27 : vector<2x8x1xf32> to vector<2x8x128xf32>
    %54 = arith.mulf %52, %53 : vector<2x8x128xf32>
    %cst_13 = arith.constant 9.99999974E-6 : f32
    %55 = vector.broadcast %cst_13 : f32 to vector<2x8x128xf32>
    %56 = arith.maximumf %54, %55 : vector<2x8x128xf32>
    %cst_14 = arith.constant -1.000000e+30 : f32
    %57 = vector.shape_cast %47 : vector<2x1x128xi1> to vector<2x1x128xi1>
    %58 = vector.broadcast %57 : vector<2x1x128xi1> to vector<2x8x128xi1>
    %59 = vector.broadcast %cst_14 : f32 to vector<2x8x128xf32>
    %60 = arith.select %58, %56, %59 : vector<2x8x128xi1>, vector<2x8x128xf32>
    %cst_15 = arith.constant dense<0xFF800000> : vector<2x8xf32>
    %61 = vector.multi_reduction <maximumf>, %60, %cst_15 [2] : vector<2x8x128xf32> to vector<2x8xf32>
    %62 = vector.shape_cast %61 : vector<2x8xf32> to vector<2x8x1xf32>
    %63 = vector.broadcast %62 : vector<2x8x1xf32> to vector<2x8x128xf32>
    %64 = arith.subf %60, %63 : vector<2x8x128xf32>
    %65 = math.exp %64 : vector<2x8x128xf32>
    %cst_16 = arith.constant dense<0.000000e+00> : vector<2x8xf32>
    %66 = vector.multi_reduction <add>, %65, %cst_16 [2] : vector<2x8x128xf32> to vector<2x8xf32>
    %67 = vector.shape_cast %66 : vector<2x8xf32> to vector<2x8x1xf32>
    %68 = math.log %67 : vector<2x8x1xf32>
    %69 = arith.addf %62, %68 : vector<2x8x1xf32>
    %70 = arith.mulf %40, %27 : vector<2x8x1xf32>
    %cst_17 = arith.constant 9.99999974E-6 : f32
    %71 = vector.broadcast %cst_17 : f32 to vector<2x8x1xf32>
    %72 = arith.maximumf %70, %71 : vector<2x8x1xf32>
    %73 = arith.subf %69, %72 : vector<2x8x1xf32>
    %cst_18 = arith.constant 0.000000e+00 : f32
    %74 = vector.broadcast %cst_18 : f32 to vector<2x8x1xf32>
    %75 = arith.select %18, %73, %74 : vector<2x8x1xi1>, vector<2x8x1xf32>
    %76 = vector.shape_cast %75 : vector<2x8x1xf32> to vector<1x2x8x1xf32>
    %cst_19 = arith.constant dense<0.000000e+00> : vector<1xf32>
    %77 = vector.multi_reduction <add>, %76, %cst_19 [1, 2, 3] : vector<1x2x8x1xf32> to vector<1xf32>
    %78 = vector.shape_cast %77 : vector<1xf32> to vector<1x1x1x1xf32>
    %79 = vector.extract %78[0, 0, 0, 0] : f32 from vector<1x1x1x1xf32>
    %c0_i32 = arith.constant 0 : i32
    %80 = arith.cmpi eq, %arg1, %c0_i32 : i32
    %81 = arith.extui %80 : i1 to i32
    %c0_i32_20 = arith.constant 0 : i32
    %82 = arith.cmpi ne, %81, %c0_i32_20 : i32
    scf.if %82 {
      %cst_27 = arith.constant 0.000000e+00 : f32
      %87 = vector.broadcast %cst_27 : f32 to vector<1x8x128xf32>
      %c0_28 = arith.constant 0 : index
      %c0_29 = arith.constant 0 : index
      %c0_30 = arith.constant 0 : index
      %88 = vector.load %arg4[%c0_28, %c0_29, %c0_30] : memref<1x8x128xf32, #tpu.memory_space<vmem>>, vector<1x8x128xf32>
      tpu.vector_store %arg4[%c0_28, %c0_29, %c0_30], %87 {strides = array<i32>} : memref<1x8x128xf32, #tpu.memory_space<vmem>>, vector<1x8x128xf32>,
    } else {
    }
    %c0_21 = arith.constant 0 : index
    %c0_22 = arith.constant 0 : index
    %c0_23 = arith.constant 0 : index
    %83 = vector.load %arg4[%c0_21, %c0_22, %c0_23] : memref<1x8x128xf32, #tpu.memory_space<vmem>>, vector<1x8x128xf32>
    %84 = vector.broadcast %79 : f32 to vector<1x8x128xf32>
    %85 = arith.addf %83, %84 : vector<1x8x128xf32>
    %c0_24 = arith.constant 0 : index
    %c0_25 = arith.constant 0 : index
    %c0_26 = arith.constant 0 : index
    %86 = vector.load %arg4[%c0_24, %c0_25, %c0_26] : memref<1x8x128xf32, #tpu.memory_space<vmem>>, vector<1x8x128xf32>
    tpu.vector_store %arg4[%c0_24, %c0_25, %c0_26], %85 {strides = array<i32>} : memref<1x8x128xf32, #tpu.memory_space<vmem>>, vector<1x8x128xf32>,
    return
  }
  func.func @transform_0(%arg0: i32, %arg1: i32) -> (i32, i32, i32) {
    %c3_i32 = arith.constant 3 : i32
    %0 = arith.muli %arg0, %c3_i32 : i32
    %1 = arith.addi %0, %arg1 : i32
    %c0_i32 = arith.constant 0 : i32
    %c0_i32_0 = arith.constant 0 : i32
    %c0_i32_1 = arith.constant 0 : i32
    return %1, %c0_i32, %c0_i32_0 : i32, i32, i32
  }
  func.func @transform_1(%arg0: i32, %arg1: i32) -> (i32, i32) {
    %c0_i32 = arith.constant 0 : i32
    %c0_i32_0 = arith.constant 0 : i32
    %c0_i32_1 = arith.constant 0 : i32
    return %c0_i32, %c0_i32_0 : i32, i32
  }
  func.func @transform_2(%arg0: i32, %arg1: i32) -> (i32, i32, i32) {
    %c0_i32 = arith.constant 0 : i32
    %c0_i32_0 = arith.constant 0 : i32
    %c0_i32_1 = arith.constant 0 : i32
    return %arg0, %c0_i32, %c0_i32_0 : i32, i32, i32
  }
}

</mosaic_0001>

<bundles_post_ra>
// kernel: tpu_custom_call.1
= control target key start
LH: loop header
LB: loop body
LE: loop exit
PB: predicated region body
PF: predicated region fallthrough
CT: control target
= control target key end

     0   :  { %7 = vsyncpa [#allocation3], 0  ;;  %s1065_s0 = inlined_call_operand.hbm [shape: f32[6,8,128], index: 0, kind: input, shape index: {}]   ;;  %s1066_s1 = inlined_call_operand.hbm [shape: f32[128,128], index: 1, kind: input, shape index: {}]   ;;  %s1067_s2 = inlined_call_operand.hbm [shape: f32[1,8,128], index: 2, kind: output, shape index: {}]  }
   0x1   :  { %9 = vsyncpa [#allocation3 + $0x1], 0 }
   0x2   :  { %10 = vsyncpa [#allocation6], 0 }
   0x3   :  { %11 = vsyncpa [#allocation4], 0  ;;  %s854_s9 = smov 0   ;;  %s856_s10 = smov 0  }
   0x4   :  { %s858_s11 = smov 0   ;;  %s860_s12 = smov 0  }
   0x5   :  { %s862_s13 = smov 0   ;;  %s864_s14 = smov 0  }
   0x6 LB: > { %s493_s15 = sadd.s32 4294967295, %s831_s14   ;;  %p53_p0 = scmp.ne.s32.totalorder %s815_s10, %s811_s9  ;;  %s831_s14 = sphi %s864_s14, %s17_s14   ;;  %s827_s13 = sphi %s862_s13, %s1089_s13   ;;  %s823_s12 = sphi %s860_s12, %s1088_s12   ;;  %s819_s11 = sphi %s858_s11, %s1087_s11   ;;  %s815_s10 = sphi %s856_s10, %s1086_s10   ;;  %s811_s9 = sphi %s854_s9, %s1085_s9  }
   0x7   : > { %p886_p1 = scmp.eq.s32.totalorder %s493_s15, 0  ;;  %p494_p2 = scmp.ge.s32.totalorder %s831_s14, 1 }
   0x8   : > { %p111_p3 = scmp.lt.s32.totalorder %s831_s14, 4  ;;  %s833_s19 = smov [#allocation5]  }
   0x9   : > { %s1072_s16 = scalar_select %p886_p1, 1, 0 }
   0xa   : > { %p894_p4 = por %p886_p1, %p53_p0  ;;  %p898_p5 = pnand %p494_p2, %p111_p3 }
   0xb   : > { %s123_s20 = sshll.u32 %s833_s19, 4  ;;  %s26_s22 = sadd.s32 1, %s827_s13  ;;  %s124_s20 = int_to_ptr.vmem [resolvable:$true] %s123_s20 }
   0xc   : > { %s1073_s17 = scalar_select %p894_p4, 1, 0 }
   0xd   : > { %s1074_s18 = scalar_select %p898_p5, 1, 0 }
   0xe   : > { %p607_p6 = pneg %p898_p5  ;;  %s689_s25 = scalar_lea.hbm %s1066_s1, 2048 }
   0xf   : > { %p690_p8 = scmp.ne.s32.totalorder %s1066_s1, %s689_s25  ;;  %p696_p12 = scmp.lt.u32.totalorder %s689_s25, %s1066_s1 }
  0x10   : > { %p906_p7 = pnand %p607_p6, %p886_p1 }
  0x12   : > { %p691_p9 = pneg %p906_p7 }
  0x14   : > { %p692_p10 = pnand %p691_p9, %p690_p8 }
  0x16   : > { %p693_p11 = pneg %p692_p10 }
  0x18   : > { %p698_p13 = pnand %p696_p12, %p693_p11 }
  0x1a   : > { %701 = shalt.err (!%p698_p13)
}
  0x1b   : > { %s702_s30 = scalar_lea.vmem %s124_s20, 2048  ;;  %p710_p6 = scmp.lt.s32.totalorder %s124_s20, %s124_s20 }
  0x1c   : > { %p703_p0 = scmp.ne.s32.totalorder %s124_s20, %s702_s30  ;;  %p711_p1 = scmp.lt.s32.totalorder %s702_s30, %s702_s30 }
  0x1e   : > { %p705_p2 = pnand %p703_p0, %p691_p9  ;;  %p712_p4 = por %p711_p1, %p710_p6 }
  0x20   : > { %p706_p3 = pneg %p705_p2 }
  0x22   : > { %p713_p5 = pnand %p712_p4, %p706_p3 }
  0x24   : > { %716 = shalt.err (!%p713_p5)
}
  0x25   : > { %s834_s3 = smov 128   ;;  %s835_s4 = smov 8  }
  0x26   : > { %610 = dma.hbm_to_vmem [thread:$0]  (!%p906_p7), %s1066_s1, 2048, %s124_s20, [#allocation6], %s834_s3, %s834_s3, %s835_s4  }
  0x27   : > { %p27_p1 = scmp.ge.s32.totalorder %s26_s22, 3  ;;  %s40_s7 = sadd.s32 1, %s819_s11 }
  0x28   : > { %p47_p4 = scmp.ne.s32.totalorder %s819_s11, %s815_s10  ;;  %p48_p5 = scmp.eq.s32.totalorder %s831_s14, 0 }
  0x29   : > { %s1091_s22 = smov (%p27_p1, %s26_s22), 0  ;;  %p616_p9 = scmp.lt.s32.totalorder %s831_s14, 3 }
  0x2a   : > { %p49_p8 = por %p48_p5, %p47_p4  ;;  %s37_s8 = ssub.s32 %s827_s13, %s1091_s22 }
  0x2b   : > { %s137_s9 = sand.u32 1, %s819_s11   ;;  %p38_p10 = scmp.eq.s32.totalorder %s37_s8, 0 }
  0x2c   : > { %s497_s19 = sshll.u32 %s137_s9, 4  ;;  %s509_s21 = sshll.u32 %s827_s13, 8 }
  0x2d   : > { %s942_s23 = scalar_select %p38_p10, %s819_s11, %s40_s7  }
  0x2e   : > { %s947_s20 = scalar_lea.hbm %s1065_s0, %s509_s21  ;;  %s141_s26 = scalar_lea.vmem [#allocation2], %s497_s19 }
  0x2f   : > { %s150_s27 = sshll.u32 %s141_s26, 4  ;;  %p949_p7 = pnand %p616_p9, %p49_p8  ;;  %s953_s27 = int_to_ptr.vmem [resolvable:$true] %s150_s27 }
  0x30   : > { %s955_s29 = scalar_lea.sflag [#allocation3], %s137_s9  ;;  %s717_s30 = scalar_lea.hbm %s947_s20, 256 }
  0x31   : > { %p718_p11 = scmp.ne.s32.totalorder %s947_s20, %s717_s30  ;;  %p719_p12 = pneg %p949_p7 }
  0x32   : > { %s722_s7 = scalar_lea.hbm %s1065_s0, 768  ;;  %p723_p2 = scmp.lt.u32.totalorder %s947_s20, %s1065_s0 }
  0x33   : > { %p720_p13 = pnand %p719_p12, %p718_p11  ;;  %p724_p3 = scmp.lt.u32.totalorder %s722_s7, %s717_s30 }
  0x34   : > { %p726_p1 = scmp.lt.u32.totalorder %s717_s30, %s947_s20 }
  0x35   : > { %p721_p0 = pneg %p720_p13  ;;  %p725_p6 = por %p724_p3, %p723_p2 }
  0x37   : > { %p727_p4 = por %p726_p1, %p725_p6 }
  0x39   : > { %p728_p5 = pnand %p727_p4, %p721_p0 }
  0x3b   : > { %731 = shalt.err (!%p728_p5)
}
  0x3c   : > { %s732_s9 = scalar_lea.vmem %s953_s27, 256  ;;  %s836_s21 = smov [#allocation2]  }
  0x3d   : > { %p733_p8 = scmp.ne.s32.totalorder %s953_s27, %s732_s9  ;;  %s737_s24 = sshll.u32 %s836_s21, 4  ;;  %s738_s24 = int_to_ptr.vmem [resolvable:$false] %s737_s24 }
  0x3e   : > { %s739_s25 = scalar_lea.vmem %s738_s24, 512  ;;  %p740_p11 = scmp.lt.s32.totalorder %s953_s27, %s738_s24 }
  0x3f   : > { %p735_p9 = pnand %p733_p8, %p719_p12  ;;  %p741_p13 = scmp.lt.s32.totalorder %s739_s25, %s732_s9 }
  0x41   : > { %p736_p10 = pneg %p735_p9  ;;  %p742_p2 = por %p741_p13, %p740_p11 }
  0x43   : > { %p743_p3 = pnand %p742_p2, %p736_p10 }
  0x45   : > { %746 = shalt.err (!%p743_p3)
}
  0x46   : > { %614 = dma.hbm_to_vmem [thread:$0]  (!%p949_p7), %s947_s20, 256, %s953_s27, %s955_s29, %s834_s3, %s834_s3, %s835_s4  }
  0x47   : > { %p1077_p12 = scmp.ne.s32.totalorder %s1074_s18, 0 }
  0x48   : > { %s164_s26 = sand.u32 (!%p1077_p12), 1, %s815_s10   ;;  %p1078_p0 = scmp.ne.s32.totalorder (!%p1077_p12), %s1073_s17, 0 }
  0x49   : > { %162 = sbr.rel (%p1077_p12) target bundleno = 887 (0x377), region = 28  ;;  %s501_s30 = sshll.u32 (!%p1077_p12), %s164_s26, 4 }
  0x4a   : > { %s165_s5 = scalar_lea.sflag (!%p1077_p12), [#allocation3], %s164_s26  ;;  %s168_s6 = scalar_lea.vmem (!%p1077_p12), [#allocation2], %s501_s30 }
  0x50   : > { %798 = dma.done.wait (%p1078_p0), %s165_s5, 256  }
  0x51   : > { %800 = vsyncadd (%p1078_p0), %s165_s5, 4294967040  ;;  %p1079_p6 = scmp.ne.s32.totalorder %s1072_s16, 0 }
  0x53   : > { %802 = dma.done.wait (%p1079_p6), [#allocation6], 2048  }
  0x54   : > { %804 = vsyncadd (%p1079_p6), [#allocation6], 4294965248  ;;  %v241_v0 = vld [vmem:[#allocation5] sm:$0xff]  ;;  %v242_v1 = vld [vmem:[#allocation5 + $0x8] sm:$0xff]  ;;  %s503_s16 = sshll.u32 %s823_s12, 1  ;;  %v212_v53 = vlaneseq  ;;  %vm389_vm8 = vcmask 7168  }
  0x55   : > { %v243_v2 = vld [vmem:[#allocation5 + $0x10] sm:$0xff]  ;;  %v563_v3 = vpack.c.bf16 %v242_v1, %v241_v0  ;;  %v244_v4 = vld [vmem:[#allocation5 + $0x18] sm:$0xff]  ;;  %v245_v6 = vld [vmem:[#allocation5 + $0x20] sm:$0xff]  ;;  %v214_v51 = vstv %s503_s16  ;;  %p504_p7 = scmp.ne.s32.totalorder %s823_s12, 0 }
  0x56   : > { %v567_v5 = vpack.c.bf16 %v244_v4, %v243_v2  ;;  %v246_v7 = vld [vmem:[#allocation5 + $0x28] sm:$0xff]  ;;  %v194_v9 = vld [vmem:[%s168_s6] sm:$0xff]  ;;  %v248_v12 = vld [vmem:[#allocation5 + $0x38] sm:$0xff]  ;;  %v215_v54 = vadd.s32 1, %v214_v51  ;;  %v213_v55 = vshrl.u32 %v212_v53, 7  ;;  %vm217_vm3 = vcmp.lt.s32.totalorder %v214_v51, 5 }
  0x57   : > { %564 = vmatprep.subr.bf16.mxu0 %v563_v3  ;;  %v571_v8 = vpack.c.bf16 %v246_v7, %v245_v6  ;;  %v195_v10 = vld [vmem:[%s168_s6 + $0x8] sm:$0xff]  ;;  %v247_v11 = vld [vmem:[#allocation5 + $0x30] sm:$0xff]  ;;  %560 = vmatprep.mubr.f32.mxu0 %v194_v9  ;;  %v196_v13 = vrot.slane %v194_v9, 4  ;;  %v221_v15 = vmul.f32 %v194_v9, %v194_v9  ;;  %v249_v20 = vld [vmem:[#allocation5 + $0x40] sm:$0xff] }
  0x58   : > { %566 = vmatpush3.bf16.msra.mxu0 %v563_v3  ;;  %v202_v14 = vrot.slane %v195_v10, 4  ;;  %v222_v18 = vmul.f32 %v195_v10, %v195_v10  ;;  %v575_v19 = vpack.c.bf16 %v248_v12, %v247_v11  ;;  %v250_v21 = vld [vmem:[#allocation5 + $0x48] sm:$0xff]  ;;  %v251_v27 = vld [vmem:[#allocation5 + $0x50] sm:$0xff]  ;;  %v252_v28 = vld [vmem:[#allocation5 + $0x58] sm:$0xff]  ;;  %vm218_vm0 = vcmp.lt.s32.totalorder %v215_v54, 5 }
  0x59   : > { %568 = vmatprep.subr.bf16.mxu0 %v567_v5  ;;  %v197_v16 = vadd.f32 %v196_v13, %v194_v9  ;;  %223 = vadd.xlane.f32.xlu1 %v221_v15  ;;  %v579_v26 = vpack.c.bf16 %v250_v21, %v249_v20  ;;  %v583_v33 = vpack.c.bf16 %v252_v28, %v251_v27  ;;  %v253_v34 = vld [vmem:[#allocation5 + $0x60] sm:$0xff]  ;;  %v254_v35 = vld [vmem:[#allocation5 + $0x68] sm:$0xff]  ;;  %v255_v41 = vld [vmem:[#allocation5 + $0x70] sm:$0xff]  ;;  %vm216_vm1 = vcmp.lt.s32.totalorder %v213_v55, 6 }
  0x5a   : > { %v203_v17 = vadd.f32 %v202_v14, %v195_v10  ;;  %v587_v40 = vpack.c.bf16 %v254_v35, %v253_v34  ;;  %v256_v42 = vld [vmem:[#allocation5 + $0x78] sm:$0xff]  ;;  %vm998_vm2 = vmand %vm216_vm1, %vm218_vm0 }
  0x5b   : > { %v198_v22 = vrot.slane %v197_v16, 2  ;;  %v591_v46 = vpack.c.bf16 %v256_v42, %v255_v41  ;;  %vm1006_vm4 = vmand %vm216_vm1, %vm217_vm3 }
  0x5c   : > { %570 = vmatpush3.bf16.msra.mxu0 %v567_v5  ;;  %v204_v23 = vrot.slane %v203_v17, 2  ;;  %v343_v5 = vand.u32 127, %v212_v53  ;;  %v837_v53 = vmov (!%p504_p7), 0.0  }
  0x5d   : > { %572 = vmatprep.subr.bf16.mxu0 %v571_v8  ;;  %v199_v24 = vadd.f32 %v198_v22, %v197_v16  ;;  %225 = vadd.xlane.f32.xlu1 %v222_v18  ;;  %406 = vst [vmem:[#allocation7] sm:$0xff] (!%p504_p7), %v837_v53 }
  0x5e   : > { %v205_v25 = vadd.f32 %v204_v23, %v203_v17  ;;  %vm345_vm5 = vcmp.eq.s32.totalorder %v343_v5, %v215_v54  ;;  %vm344_vm6 = vcmp.eq.s32.totalorder %v343_v5, %v214_v51  ;;  %vm346_vm7 = vcmp.lt.s32.totalorder %v343_v5, 5 }
  0x5f   : > { %v200_v29 = vrot.slane %v199_v24, 1 }
  0x60   : > { %574 = vmatpush3.bf16.msra.mxu0 %v571_v8  ;;  %v206_v30 = vrot.slane %v205_v25, 1 }
  0x61   : > { %576 = vmatprep.subr.bf16.mxu0 %v575_v19  ;;  %v201_v31 = vadd.f32 %v200_v29, %v199_v24 }
  0x62   : > { %v207_v32 = vadd.f32 %v206_v30, %v205_v25 }
  0x63   : > { %v208_v36 = vsub.f32 %v201_v31, %v194_v9 }
  0x64   : > { %578 = vmatpush3.bf16.msra.mxu0 %v575_v19  ;;  %v209_v37 = vsub.f32 %v207_v32, %v195_v10 }
  0x65   : > { %580 = vmatprep.subr.bf16.mxu0 %v579_v26  ;;  %v210_v38 = vmul.f32 0.2, %v208_v36 }
  0x66   : > { %v211_v39 = vmul.f32 0.2, %v209_v37 }
  0x67   : > { %v227_v43 = vmul.f32 %v210_v38, %v210_v38  ;;  %v332_v47 = vmul.f32 %v210_v38, %v194_v9 }
  0x68   : > { %582 = vmatpush3.bf16.msra.mxu0 %v579_v26  ;;  %v333_v44 = vmul.f32 %v211_v39, %v195_v10  ;;  %v228_v45 = vmul.f32 %v211_v39, %v211_v39 }
  0x69   : > { %584 = vmatprep.subr.bf16.mxu0 %v583_v33  ;;  %229 = vadd.xlane.f32.xlu0 %v227_v43 }
  0x6a   : > { %336 = vadd.xlane.f32.xlu1 %v333_v44 }
  0x6c   : > { %586 = vmatpush3.bf16.msra.mxu0 %v583_v33 }
  0x6d   : > { %588 = vmatprep.subr.bf16.mxu0 %v587_v40  ;;  %231 = vadd.xlane.f32.xlu0 %v228_v45 }
  0x70   : > { %590 = vmatpush3.bf16.msra.mxu0 %v587_v40 }
  0x71   : > { %592 = vmatprep.subr.bf16.mxu0 %v591_v46  ;;  %334 = vadd.xlane.f32.xlu0 %v332_v47 }
  0x74   : > { %594 = vmatpush3.bf16.msra.mxu0 %v591_v46 }
  0x77   : > { %561 = vmatmul.mubr.f32.vlgmr.msra.gmra.mrb[0].mxu0 %v195_v10 }
  0xe6   : > { %v224_v48 = vpop.xlane.xlu1 %223 }
  0xea   : > { %v226_v50 = vpop.xlane.xlu1 %225 }
  0xeb   : > { %673 = vrsqrt.f32 %v226_v50 }
  0xf5   : > { %v674_v57 = vpop.eup %673 }
  0xf6   : > { %v230_v49 = vpop.xlane.xlu0 %229  ;;  %v236_v62 = vsel %vm998_vm2, %v674_v57, 0.0 }
  0xf7   : > { %v337_v58 = vpop.xlane.xlu1 %336 }
  0xfa   : > { %v232_v52 = vpop.xlane.xlu0 %231 }
  0xfb   : > { %675 = vrsqrt.f32 %v232_v52 }
  0xfc   : > { %677 = vrsqrt.f32 %v230_v49 }
  0xfd   : > { %679 = vrsqrt.f32 %v224_v48 }
  0xfe   : > { %v335_v4 = vpop.xlane.xlu0 %334 }
 0x105   : > { %v676_v59 = vpop.eup %675 }
 0x106   : > { %v240_v60 = vsel %vm998_vm2, %v676_v59, 0.0  ;;  %v678_v1 = vpop.eup %677 }
 0x107   : > { %v339_v61 = vmul.f32 %v337_v58, %v240_v60  ;;  %v239_v3 = vsel %vm1006_vm4, %v678_v1, 0.0  ;;  %v680_v7 = vpop.eup %679 }
 0x108   : > { %v338_v6 = vmul.f32 %v335_v4, %v239_v3  ;;  %v235_v12 = vsel %vm1006_vm4, %v680_v7, 0.0 }
 0x109   : > { %v341_v63 = vmul.f32 10.0, %v339_v61 }
 0x10a   : > { %v340_v8 = vmul.f32 10.0, %v338_v6 }
 0x10b   : > { %v382_v0 = vmul.f32 %v341_v63, %v236_v62 }
 0x10c   : > { %v381_v31 = vmul.f32 %v340_v8, %v235_v12 }
 0x10d   : > { %v384_v35 = vmax.f32 %v382_v0, 1e-05 }
 0x10e   : > { %v383_v37 = vmax.f32 %v381_v31, 1e-05 }
 0x14a   : > { %v562_v9 = vpop.f32.mrb[0].mxu0 }
 0x14b   : > { %v352_v10 = vsel %vm345_vm5, %v341_v63, %v562_v9  ;;  %v323_v11 = vpop.f32.mrb[1].mxu0 }
 0x14c   : > { %v354_v13 = vmul.f32 %v352_v10, %v236_v62  ;;  %v351_v14 = vsel %vm344_vm6, %v340_v8, %v323_v11 }
 0x14d   : > { %v353_v15 = vmul.f32 %v351_v14, %v235_v12 }
 0x14e   : > { %v356_v16 = vmax.f32 %v354_v13, 1e-05 }
 0x14f   : > { %v355_v17 = vmax.f32 %v353_v15, 1e-05 }
 0x150   : > { %v360_v18 = vsel %vm346_vm7, %v356_v16, -1e+30 }
 0x151   : > { %363 = vmax.xlane.f32.xlu1 %v360_v18  ;;  %v359_v19 = vsel %vm346_vm7, %v355_v17, -1e+30 }
 0x152   : > { %361 = vmax.xlane.f32.xlu0 %v359_v19 }
 0x1de   : > { %v364_v20 = vpop.xlane.xlu1 %363 }
 0x1df   : > { %v366_v21 = vsub.f32 %v360_v18, %v364_v20  ;;  %v362_v22 = vpop.xlane.xlu0 %361 }
 0x1e0   : > { %v365_v23 = vsub.f32 %v359_v19, %v362_v22 }
 0x1e1   : > { %v369_v24 = vmul.f32 1.442695, %v366_v21 }
 0x1e2   : > { %v367_v25 = vmul.f32 1.442695, %v365_v23 }
 0x1e3   : > { %681 = vpow2.f32 %v369_v24 }
 0x1e4   : > { %683 = vpow2.f32 %v367_v25 }
 0x1ed   : > { %v682_v26 = vpop.eup %681 }
 0x1ee   : > { %v684_v27 = vpop.eup %683  ;;  %373 = vadd.xlane.f32.xlu1 %v682_v26 }
 0x1ef   : > { %371 = vadd.xlane.f32.xlu0 %v684_v27 }
 0x27b   : > { %v374_v28 = vpop.xlane.xlu1 %373 }
 0x27c   : > { %685 = vlog2.f32 %v374_v28  ;;  %v372_v29 = vpop.xlane.xlu0 %371 }
 0x27d   : > { %687 = vlog2.f32 %v372_v29 }
 0x286   : > { %v686_v30 = vpop.eup %685 }
 0x287   : > { %v688_v32 = vpop.eup %687  ;;  %v378_v33 = vmul.f32 0.6931472, %v686_v30 }
 0x288   : > { %v376_v34 = vmul.f32 0.6931472, %v688_v32 }
 0x289   : > { %v380_v36 = vadd.f32 %v378_v33, %v364_v20 }
 0x28a   : > { %v379_v38 = vadd.f32 %v376_v34, %v362_v22 }
 0x28b   : > { %v386_v39 = vsub.f32 %v380_v36, %v384_v35 }
 0x28c   : > { %v385_v40 = vsub.f32 %v379_v38, %v383_v37 }
 0x28d   : > { %v388_v41 = vsel %vm998_vm2, %v386_v39, 0.0 }
 0x28e   : > { %v387_v42 = vsel %vm1006_vm4, %v385_v40, 0.0  ;;  %v391_v43 = vsel %vm389_vm8, %v388_v41, 0.0 }
 0x28f   : > { %v390_v44 = vsel %vm389_vm8, %v387_v42, 0.0 }
 0x290   : > { %v392_v45 = vadd.f32 %v391_v43, %v390_v44 }
 0x292   : > { %393 = vadd.xlane.f32.xlu0 %v392_v45 }
 0x31f   : > { %v394_v46 = vpop.xlane.xlu0 %393 }
 0x320   : > { %v395_v47 = vrot.slane %v394_v46, 4 }
 0x322   : > { %v396_v48 = vadd.f32 %v395_v47, %v394_v46 }
 0x324   : > { %v397_v49 = vrot.slane %v396_v48, 2 }
 0x326   : > { %v398_v50 = vadd.f32 %v397_v49, %v396_v48 }
 0x328   : > { %v399_v51 = vrot.slane %v398_v50, 1 }
 0x32a   : > { %v400_v52 = vadd.f32 %v399_v51, %v398_v50 }
 0x32c   : > { %595 = vpush %v400_v52 }
 0x357   : > { %405 = sbr.rel (%p504_p7) target bundleno = 862 (0x35e), region = 40 }
 0x35d   : > { %s596_s17 = spop %595 }
 0x35e PF: > { %v407_v54 = vld [vmem:[#allocation7] sm:$0xff]  ;;  %v408_v55 = vstv %s596_s17  ;;  %p1021_p1 = scmp.eq.s32.totalorder %s493_s15, 2  ;;  %s838_s3 = smov [#allocation7]  }
 0x35f   : > { %v409_v56 = vadd.f32 %v408_v55, %v407_v54  ;;  %s420_s4 = sshll.u32 %s838_s3, 4  ;;  %s421_s4 = int_to_ptr.vmem [resolvable:$true] %s420_s4 }
 0x360   : > { %s747_s20 = scalar_lea.vmem %s421_s4, 128  ;;  %p754_p9 = scmp.lt.s32.totalorder %s421_s4, %s421_s4 }
 0x361   : > { %410 = vst [vmem:[#allocation7] sm:$0xff] %v409_v56  ;;  %p748_p4 = scmp.ne.s32.totalorder %s421_s4, %s747_s20  ;;  %p755_p10 = scmp.lt.s32.totalorder %s747_s20, %s747_s20 }
 0x363   : > { %p749_p5 = pnand %p748_p4, %p1021_p1  ;;  %p756_p11 = por %p755_p10, %p754_p9 }
 0x365   : > { %p750_p8 = pneg %p749_p5 }
 0x367   : > { %p757_p13 = pnand %p756_p11, %p750_p8 }
 0x369   : > { %760 = shalt.err (!%p757_p13)
}
 0x36a   : > { %s761_s27 = scalar_lea.hbm %s1067_s2, 128 }
 0x36b   : > { %p762_p2 = scmp.ne.s32.totalorder %s1067_s2, %s761_s27  ;;  %p767_p0 = scmp.lt.u32.totalorder %s761_s27, %s1067_s2 }
 0x36d   : > { %p763_p3 = pnand %p762_p2, %p1021_p1 }
 0x36f   : > { %p764_p12 = pneg %p763_p3 }
 0x371   : > { %p769_p6 = pnand %p767_p0, %p764_p12 }
 0x373   : > { %772 = shalt.err (!%p769_p6)
}
 0x374   : > { %604 = dma.vmem_to_hbm [thread:$0]  (%p1021_p1), %s421_s4, 128, %s1067_s2, [#allocation4]  }
 0x375   : > { %806 = dma.done.wait (%p1021_p1), [#allocation4], 128  }
 0x376   : > { %808 = vsyncadd (%p1021_p1), [#allocation4], 4294967168 }
 0x377 PF: > { %s17_s14 = sadd.s32 1, %s831_s14   ;;  %s1085_s9 = smov %s815_s10 }
 0x378   : > { %p14_p7 = scmp.ge.s32.totalorder %s17_s14, 5   ;;  %s1086_s10 = smov %s819_s11 }
 0x379   : > { %s1087_s11 = smov %s942_s23  ;;  %s1088_s12 = smov %s827_s13 }
 0x37a   : > { %s1089_s13 = smov %s1091_s22  ;;  %16 = sbr.rel (!%p14_p7) target bundleno = 6 (0x6), region = 74 }
 0x381   :  { %433 = vsyncpa [#allocation3], 1 }
 0x382   :  { %435 = vsyncpa [#allocation3 + $0x1], 1 }
 0x383   :  { %436 = vsyncpa [#allocation6], 1 }
 0x384   :  { %437 = vsyncpa [#allocation4], 1 }
 0x385   :  { %439 = vsyncpa [#allocation4 + $0x1], 1 }

</bundles_post_ra>
